<compile_context>
chip_gen: v6e
topology: v6e:2x2x1
jax: 0.10.0
libtpu: 0.0.40
codegen_flags: <defaults>
</compile_context>

<pallas_src>
import functools

import jax
import jax.numpy as jnp
from jax.experimental import pallas as pl
from jax.experimental.pallas import tpu as pltpu


# ----------------------------------------------------------------------------
# Host-side: fold (2x bilinear upsample, align_corners=True) + reflect-pad into
# one linear map per spatial axis, then one Kronecker matrix over flat HW.
# ----------------------------------------------------------------------------
def _upsample_axis_matrix(in_size):
    """(2*in_size, in_size) matrix for scale-2 bilinear upsample, align_corners=True."""
    out_size = 2 * in_size
    if in_size == 1:
        return jnp.ones((out_size, 1), jnp.float32)
    pos = jnp.arange(out_size, dtype=jnp.float32) * (in_size - 1) / (out_size - 1)
    lo = jnp.floor(pos).astype(jnp.int32)
    hi = jnp.minimum(lo + 1, in_size - 1)
    frac = pos - lo.astype(jnp.float32)
    rows = jnp.arange(out_size)
    m = jnp.zeros((out_size, in_size), jnp.float32)
    m = m.at[rows, lo].add(1.0 - frac)
    m = m.at[rows, hi].add(frac)
    return m


def _merge_axis_matrix(in_size, out_size):
    """(out_size, in_size): 2x bilinear upsample followed by reflect-pad to out_size."""
    up = _upsample_axis_matrix(in_size)                       # (2*in, in)
    up_size = 2 * in_size
    pad_lo = (out_size - up_size) // 2
    idx = jnp.arange(out_size) - pad_lo
    idx = jnp.where(idx < 0, -idx, idx)                       # torch 'reflect' (no edge repeat)
    idx = jnp.where(idx >= up_size, 2 * (up_size - 1) - idx, idx)
    return up[idx]


def build_merge_matrix(h1, w1, h2, w2):
    """(h1*w1, h2*w2) matrix M with  upsampled+reflect-padded(x1).flat = x1.flat @ M."""
    mr = _merge_axis_matrix(h1, h2)                           # (h2, h1)
    mc = _merge_axis_matrix(w1, w2)                           # (w2, w1)
    # m[h, w, y, x] = mr[y, h] * mc[x, w]   (pure broadcast multiply, exact f32)
    m = mr.T[:, None, :, None] * mc.T[None, :, None, :]       # (h1, w1, h2, w2)
    return m.reshape(h1 * w1, h2 * w2)


# ----------------------------------------------------------------------------
# In-kernel helpers: roll-based 3x3 im2col in the flat (C, HW) lane-dense layout
# ----------------------------------------------------------------------------
def _tap_masks(h, w):
    """9 lane masks ((1, h*w) bool or None): in-bounds pixels for each 3x3 tap."""
    hw = h * w
    flat = jax.lax.broadcasted_iota(jnp.int32, (1, hw), 1)
    col = flat % w
    masks = []
    for dy in (-1, 0, 1):
        for dx in (-1, 0, 1):
            conds = []
            if dy == -1:
                conds.append(flat >= w)                 # first row has nothing above
            elif dy == 1:
                conds.append(flat < (h - 1) * w)        # last row has nothing below
            if dx == -1:
                conds.append(col >= 1)                  # first column
            elif dx == 1:
                conds.append(col < w - 1)               # last column
            m = None
            for c in conds:
                m = c if m is None else jnp.logical_and(m, c)
            masks.append(m)
    return masks


def _taps_3x3(a, w, hw, masks):
    """a: (C, h*w) f32, raster order.  Returns the 9 shifted+masked taps (list)."""
    taps = []
    i = 0
    for dy in (-1, 0, 1):
        for dx in (-1, 0, 1):
            s = dy * w + dx                              # want tap[i] = a[i + s]
            # XLU lane rotate (separate VLIW slot; hides under the matmuls).
            t = a if s == 0 else pltpu.roll(a, (-s) % hw, axis=1)
            if masks[i] is not None:
                t = jnp.where(masks[i], t, 0.0)          # zero the out-of-bounds pixels
            taps.append(t)
            i += 1
    return taps


# ----------------------------------------------------------------------------
# Fused Pallas kernel: merge-skip + DoubleConv (conv/BN/ReLU x2), eval-mode BN
# ----------------------------------------------------------------------------
def _up_double_conv_kernel(x1_ref, x2_ref, up_ref, w1_ref, w2_ref, out_ref, *, h, w):
    # x1_ref : (B, C1, H1*W1)      low-res features   (compute dtype, e.g. bf16)
    # x2_ref : (B, C2, H*W)        skip connection    (compute dtype)
    # up_ref : (H1*W1, H*W)        fused upsample + reflect-pad matrix
    # w1_ref : (Cmid, 9*Cin + 1)   im2col conv1 weights, BN1 scale folded,
    #                              last column = BN1 shift (consumed via ones row)
    # w2_ref : (Cout, 9*Cmid + 1)  same for conv2 / BN2
    # out_ref: (B, Cout, H*W)      f32, lane-dense NCHW output (HW flattened)
    hw = h * w
    bb = x1_ref.shape[0]
    cd = w1_ref.dtype

    masks = _tap_masks(h, w)                 # hoisted: shared by both convs & batch
    ones_row = jnp.ones((1, hw), jnp.float32)

    for b in range(bb):   # static; for large B, stack images along lanes instead
        # -- fused merge-skip: x1 -> 2x bilinear (+ reflect pad), concat with x2 --
        x1u = jnp.dot(x1_ref[b], up_ref[...],
                      preferred_element_type=jnp.float32)             # (C1, HW)
        merged = jnp.concatenate(
            [x2_ref[b].astype(jnp.float32), x1u], axis=0)             # (Cin, HW)

        # -- conv1 (3x3, pad 1) + BN1 + ReLU : one im2col MXU matmul --
        p1 = jnp.concatenate(_taps_3x3(merged, w, hw, masks) + [ones_row],
                             axis=0).astype(cd)                       # (9*Cin+1, HW)
        y1 = jnp.maximum(
            jnp.dot(w1_ref[...], p1, preferred_element_type=jnp.float32), 0.0)

        # -- conv2 (3x3, pad 1) + BN2 + ReLU --
        p2 = jnp.concatenate(_taps_3x3(y1, w, hw, masks) + [ones_row],
                             axis=0).astype(cd)                       # (9*Cmid+1, HW)
        y2 = jnp.maximum(
            jnp.dot(w2_ref[...], p2, preferred_element_type=jnp.float32), 0.0)

        out_ref[b] = y2.astype(out_ref.dtype)                         # lane-dense store


def _pick_batch_block(n):
    """Largest divisor of n that still leaves >=2 grid steps, so both v7x
    TensorCores get work; on 1-TC chips the extra ~0.35us step is negligible."""
    if n <= 1:
        return 1
    for b in range(n // 2, 0, -1):
        if n % b == 0:
            return b
    return 1


def up_forward(x1_nchw, x2_nchw, params, *, compute_dtype=jnp.bfloat16):
    """Up.forward (NCHW in / NCHW out, like PyTorch), fully fused in one kernel."""
    n, c1, h1, w1 = x1_nchw.shape
    n2, c2, h2, w2 = x2_nchw.shape
    assert n == n2
    hw1, hw2 = h1 * w1, h2 * w2
    cmid, k1 = params["w1_aug"].shape
    cout, k2 = params["w2_aug"].shape
    assert k1 == 9 * (c1 + c2) + 1 and k2 == 9 * cmid + 1

    # bf16 at the call boundary (halves activation DMA bytes; MXU runs bf16 anyway).
    upmat = build_merge_matrix(h1, w1, h2, w2).astype(compute_dtype)
    x1f = x1_nchw.reshape(n, c1, hw1).astype(compute_dtype)   # free reshape, no transpose
    x2f = x2_nchw.reshape(n, c2, hw2).astype(compute_dtype)
    w1a = params["w1_aug"].astype(compute_dtype)
    w2a = params["w2_aug"].astype(compute_dtype)

    bb = _pick_batch_block(n)
    kernel = functools.partial(_up_double_conv_kernel, h=h2, w=w2)

    # NOTE: at production U-Net sizes, tile the grid over output row-blocks with a
    # 2-row halo and budget VMEM against v7x's 64 MiB (32 MiB default scoped limit),
    # setting vmem_limit_bytes explicitly.  At these test sizes everything fits.
    out = pl.pallas_call(
        kernel,
        out_shape=jax.ShapeDtypeStruct((n, cout, hw2), jnp.float32),
        grid_spec=pltpu.PrefetchScalarGridSpec(
            num_scalar_prefetch=0,
            grid=(n // bb,),
            in_specs=[
                pl.BlockSpec((bb, c1, hw1), lambda i: (i, 0, 0)),
                pl.BlockSpec((bb, c2, hw2), lambda i: (i, 0, 0)),
                pl.BlockSpec((hw1, hw2), lambda i: (0, 0)),
                pl.BlockSpec((cmid, k1), lambda i: (0, 0)),
                pl.BlockSpec((cout, k2), lambda i: (0, 0)),
            ],
            out_specs=pl.BlockSpec((bb, cout, hw2), lambda i: (i, 0, 0)),
        ),
        compiler_params=pltpu.CompilerParams(
            dimension_semantics=("parallel",)),
    )(x1f, x2f, upmat, w1a, w2a)
    return out.reshape(n, cout, h2, w2)   # already channels-first -> NCHW


# ----------------------------------------------------------------------------
# Pure-JAX references
# ----------------------------------------------------------------------------
def _upsample_reflect_reference(x1_nchw, h2, w2):
    """2x bilinear upsample (align_corners=True) + reflect pad to (h2, w2)."""
    _, _, h1, w1 = x1_nchw.shape
    mr = _upsample_axis_matrix(h1)
    mc = _upsample_axis_matrix(w1)
    up = jnp.einsum("yh,nchw,xw->ncyx", mr, x1_nchw, mc,
                    precision=jax.lax.Precision.HIGHEST)
    dy, dx = h2 - 2 * h1, w2 - 2 * w1
    if dy or dx:
        up = jnp.pad(up, ((0, 0), (0, 0),
                          (dy // 2, dy - dy // 2), (dx // 2, dx - dx // 2)),
                     mode="reflect")
    return up


def up_forward_reference(x1_nchw, x2_nchw, raw):
    """True f32 reference (unfused BN, unfused merge-skip)."""
    eps = 1e-5
    h2, w2 = x2_nchw.shape[2], x2_nchw.shape[3]
    x1u = _upsample_reflect_reference(x1_nchw, h2, w2)
    x = jnp.concatenate([x2_nchw, x1u], axis=1)               # channel order [x2, x1]
    x = jnp.transpose(x, (0, 2, 3, 1))                        # NHWC
    y = jax.lax.conv_general_dilated(
        x, raw["w1"], (1, 1), "SAME",
        dimension_numbers=("NHWC", "HWIO", "NHWC"),
        precision=jax.lax.Precision.HIGHEST)
    y = (y - raw["mu1"]) * (raw["g1"] / jnp.sqrt(raw["var1"] + eps)) + raw["be1"]
    y = jnp.maximum(y, 0.0)
    y = jax.lax.conv_general_dilated(
        y, raw["w2"], (1, 1), "SAME",
        dimension_numbers=("NHWC", "HWIO", "NHWC"),
        precision=jax.lax.Precision.HIGHEST)
    y = (y - raw["mu2"]) * (raw["g2"] / jnp.sqrt(raw["var2"] + eps)) + raw["be2"]
    y = jnp.maximum(y, 0.0)
    return jnp.transpose(y, (0, 3, 1, 2))


def _conv3x3_aug_reference(xf, w_aug, h, w):
    """xf: (N, C, h*w) f32; w_aug: (Cout, 9*C+1) with bias column. SAME 3x3 conv."""
    n, c, _ = xf.shape
    xp = jnp.pad(xf.reshape(n, c, h, w), ((0, 0), (0, 0), (1, 1), (1, 1)))
    taps = [xp[:, :, dy:dy + h, dx:dx + w].reshape(n, c, h * w)
            for dy in range(3) for dx in range(3)]
    p = jnp.concatenate(taps + [jnp.ones((n, 1, h * w), xf.dtype)], axis=1)
    return jnp.einsum("ok,nkq->noq", w_aug, p, precision=jax.lax.Precision.HIGHEST)


def up_forward_mirror(x1_nchw, x2_nchw, params, compute_dtype=jnp.bfloat16):
    """Plain-JAX mirror of the kernel's exact math (same bf16 rounding points);
    differs from the Pallas output only by f32 accumulation order."""
    f32 = jnp.float32
    q = lambda a: a.astype(compute_dtype).astype(f32)
    n, c1, h1, w1 = x1_nchw.shape
    _, c2, h2, w2 = x2_nchw.shape
    hw2 = h2 * w2
    up = q(build_merge_matrix(h1, w1, h2, w2))
    x1f = q(x1_nchw.reshape(n, c1, h1 * w1))
    x2f = q(x2_nchw.reshape(n, c2, hw2))
    w1a = q(params["w1_aug"])
    w2a = q(params["w2_aug"])
    x1u = jnp.einsum("ncp,pq->ncq", x1f, up, precision=jax.lax.Precision.HIGHEST)
    merged = jnp.concatenate([x2f, q(x1u)], axis=1)
    y1 = jnp.maximum(_conv3x3_aug_reference(merged, w1a, h2, w2), 0.0)
    y2 = jnp.maximum(_conv3x3_aug_reference(q(y1), w2a, h2, w2), 0.0)
    return y2.reshape(n, -1, h2, w2)


# ----------------------------------------------------------------------------
# Deterministic parameter construction (synthetic weights, eval-mode BN)
# ----------------------------------------------------------------------------
def make_params(key, in_channel, out_channel):
    mid_channel = in_channel // 2
    eps = 1e-5
    ks = jax.random.split(key, 10)

    # Conv weights in HWIO layout.
    w1 = 0.1 * jax.random.normal(ks[0], (3, 3, in_channel, mid_channel), jnp.float32)
    w2 = 0.1 * jax.random.normal(ks[1], (3, 3, mid_channel, out_channel), jnp.float32)

    g1 = 1.0 + 0.1 * jax.random.normal(ks[2], (mid_channel,), jnp.float32)
    be1 = 0.1 * jax.random.normal(ks[3], (mid_channel,), jnp.float32)
    mu1 = 0.1 * jax.random.normal(ks[4], (mid_channel,), jnp.float32)
    var1 = 0.5 + jnp.abs(jax.random.normal(ks[5], (mid_channel,), jnp.float32))

    g2 = 1.0 + 0.1 * jax.random.normal(ks[6], (out_channel,), jnp.float32)
    be2 = 0.1 * jax.random.normal(ks[7], (out_channel,), jnp.float32)
    mu2 = 0.1 * jax.random.normal(ks[8], (out_channel,), jnp.float32)
    var2 = 0.5 + jnp.abs(jax.random.normal(ks[9], (out_channel,), jnp.float32))

    s1 = g1 / jnp.sqrt(var1 + eps)
    b1 = be1 - mu1 * s1
    s2 = g2 / jnp.sqrt(var2 + eps)
    b2 = be2 - mu2 * s2

    # Fold BN scale into conv weights (im2col layout, transposed orientation) and
    # append the BN shift as a bias column (consumed via a ones row in the slab):
    #   w1_aug[m, (ky*3+kx)*Cin + c] = w1[ky,kx,c,m] * s1[m];  w1_aug[m, -1] = b1[m]
    w1r = jnp.transpose(w1 * s1[None, None, None, :], (3, 0, 1, 2)).reshape(
        mid_channel, 9 * in_channel)
    w2r = jnp.transpose(w2 * s2[None, None, None, :], (3, 0, 1, 2)).reshape(
        out_channel, 9 * mid_channel)
    params = {
        "w1_aug": jnp.concatenate([w1r, b1[:, None]], axis=1),
        "w2_aug": jnp.concatenate([w2r, b2[:, None]], axis=1),
    }
    raw = {"w1": w1, "w2": w2,
           "g1": g1, "be1": be1, "mu1": mu1, "var1": var1,
           "g2": g2, "be2": be2, "mu2": mu2, "var2": var2}
    return params, raw


if __name__ == "__main__":
    # Up(in_channel=8, out_channel=8, bilinear=True)
    #   x1: low-res features, in_channel//2 = 4 channels, 8x8
    #   x2: skip connection,  in_channel//2 = 4 channels, 16x16
    in_channel, out_channel = 8, 8
    key = jax.random.PRNGKey(0)
    key1, key2, keyp, keyr = jax.random.split(key, 4)

    x1 = jax.random.normal(key1, (2, in_channel // 2, 8, 8), jnp.float32)     # NCHW
    x2 = jax.random.normal(key2, (2, in_channel // 2, 16, 16), jnp.float32)   # NCHW
    params, raw = make_params(keyp, in_channel, out_channel)

    fwd = jax.jit(functools.partial(up_forward, params=params))
    y = fwd(x1, x2)
    jax.block_until_ready(y)

    assert y.shape == (2, out_channel, 16, 16), y.shape
    assert bool(jnp.all(jnp.isfinite(y)))

    # Tight check: mirror of the kernel math with identical bf16 rounding points;
    # only f32 accumulation order differs.
    y_mirror = up_forward_mirror(x1, x2, params)
    err_m = float(jnp.max(jnp.abs(y - y_mirror)))
    assert bool(jnp.allclose(y, y_mirror, atol=5e-3, rtol=5e-3)), err_m

    # Loose check: true f32 reference with unfolded BN (bounds the bf16 MXU error).
    y_ref = up_forward_reference(x1, x2, raw)
    err_r = float(jnp.max(jnp.abs(y - y_ref)))
    assert bool(jnp.allclose(y, y_ref, atol=1e-1, rtol=1e-1)), err_r

    # Reflect-pad fold coverage: an odd size mismatch exercises the reflect branch
    # of the merge matrix that the kernel consumes.
    xa = jax.random.normal(keyr, (1, 3, 5, 7), jnp.float32)
    m = build_merge_matrix(5, 7, 11, 15)
    got = jnp.einsum("ncp,pq->ncq", xa.reshape(1, 3, 35), m,
                     precision=jax.lax.Precision.HIGHEST).reshape(1, 3, 11, 15)
    ref = _upsample_reflect_reference(xa, 11, 15)
    assert bool(jnp.allclose(got, ref, atol=1e-4, rtol=1e-4))

    print("KERNEL_OK")
</pallas_src>

<mosaic_0001>
module attributes {stable_mosaic.version = 11 : i64} {
  func.func private @main(%arg0: i32) attributes {dimension_semantics = [#tpu.dimension_semantics<core_parallel>], iteration_bounds = array<i64: 2>, tpu.core_type = #tpu.core_type<sc_scalar_subcore>, window_params = []} {
    return
  }
}

module attributes {stable_mosaic.version = 11 : i64} {
  func.func private @main(%arg0: i32) attributes {dimension_semantics = [#tpu.dimension_semantics<core_parallel>], iteration_bounds = array<i64: 2>, tpu.core_type = #tpu.core_type<sc_scalar_subcore>, window_params = []} {
    return
  }
}

module attributes {stable_mosaic.version = 11 : i64} {
  func.func @_up_double_conv_kernel(%arg0: i32, %arg1: memref<1x4x64xbf16, #tpu.memory_space<vmem>>, %arg2: memref<1x4x256xbf16, #tpu.memory_space<vmem>>, %arg3: memref<64x256xbf16, #tpu.memory_space<vmem>>, %arg4: memref<4x73xbf16, #tpu.memory_space<vmem>>, %arg5: memref<8x37xbf16, #tpu.memory_space<vmem>>, %arg6: memref<1x8x256xf32, #tpu.memory_space<vmem>>) attributes {dimension_semantics = [#tpu.dimension_semantics<parallel>], iteration_bounds = array<i64: 2>, scalar_prefetch = 0 : i64, scratch_operands = 0 : i64, tpu.core_type = #tpu.core_type<tc>, window_params = [{transform_indices = @transform_0, window_bounds = array<i64: 1, 4, 64>}, {transform_indices = @transform_1, window_bounds = array<i64: 1, 4, 256>}, {pipeline_mode = #tpu.pipeline_mode<synchronous>, transform_indices = @transform_2, window_bounds = array<i64: 64, 256>}, {pipeline_mode = #tpu.pipeline_mode<synchronous>, transform_indices = @transform_3, window_bounds = array<i64: 4, 73>}, {pipeline_mode = #tpu.pipeline_mode<synchronous>, transform_indices = @transform_4, window_bounds = array<i64: 8, 37>}, {transform_indices = @transform_5, window_bounds = array<i64: 1, 8, 256>}]} {
    %0 = tpu.iota {dimensions = array<i32: 1>} : vector<1x256xi32>
    %c16_i32 = arith.constant 16 : i32
    %c0_i32 = arith.constant 0 : i32
    %1 = arith.cmpi eq, %c16_i32, %c0_i32 : i32
    %c1_i32 = arith.constant 1 : i32
    %2 = arith.select %1, %c1_i32, %c16_i32 : i32
    %3 = vector.broadcast %2 : i32 to vector<1x256xi32>
    %4 = arith.remsi %0, %3 : vector<1x256xi32>
    %c0_i32_0 = arith.constant 0 : i32
    %5 = vector.broadcast %c0_i32_0 : i32 to vector<1x256xi32>
    %6 = arith.cmpi ne, %4, %5 : vector<1x256xi32>
    %c0_i32_1 = arith.constant 0 : i32
    %7 = vector.broadcast %c0_i32_1 : i32 to vector<1x256xi32>
    %8 = arith.cmpi slt, %4, %7 : vector<1x256xi32>
    %c0_i32_2 = arith.constant 0 : i32
    %9 = arith.cmpi slt, %2, %c0_i32_2 : i32
    %10 = vector.broadcast %9 : i1 to vector<1x256xi1>
    %11 = vector.broadcast %10 : vector<1x256xi1> to vector<1x256xi1>
    %12 = arith.xori %8, %11 : vector<1x256xi1>
    %13 = arith.andi %12, %6 : vector<1x256xi1>
    %14 = vector.broadcast %2 : i32 to vector<1x256xi32>
    %15 = arith.addi %4, %14 : vector<1x256xi32>
    %16 = arith.select %13, %15, %4 : vector<1x256xi1>, vector<1x256xi32>
    %c16_i32_3 = arith.constant 16 : i32
    %17 = vector.broadcast %c16_i32_3 : i32 to vector<1x256xi32>
    %18 = arith.cmpi sge, %0, %17 : vector<1x256xi32>
    %c1_i32_4 = arith.constant 1 : i32
    %19 = vector.broadcast %c1_i32_4 : i32 to vector<1x256xi32>
    %20 = arith.cmpi sge, %16, %19 : vector<1x256xi32>
    %21 = arith.andi %18, %20 : vector<1x256xi1>
    %c16_i32_5 = arith.constant 16 : i32
    %22 = vector.broadcast %c16_i32_5 : i32 to vector<1x256xi32>
    %23 = arith.cmpi sge, %0, %22 : vector<1x256xi32>
    %c16_i32_6 = arith.constant 16 : i32
    %24 = vector.broadcast %c16_i32_6 : i32 to vector<1x256xi32>
    %25 = arith.cmpi sge, %0, %24 : vector<1x256xi32>
    %c15_i32 = arith.constant 15 : i32
    %26 = vector.broadcast %c15_i32 : i32 to vector<1x256xi32>
    %27 = arith.cmpi slt, %16, %26 : vector<1x256xi32>
    %28 = arith.andi %25, %27 : vector<1x256xi1>
    %c1_i32_7 = arith.constant 1 : i32
    %29 = vector.broadcast %c1_i32_7 : i32 to vector<1x256xi32>
    %30 = arith.cmpi sge, %16, %29 : vector<1x256xi32>
    %c15_i32_8 = arith.constant 15 : i32
    %31 = vector.broadcast %c15_i32_8 : i32 to vector<1x256xi32>
    %32 = arith.cmpi slt, %16, %31 : vector<1x256xi32>
    %c240_i32 = arith.constant 240 : i32
    %33 = vector.broadcast %c240_i32 : i32 to vector<1x256xi32>
    %34 = arith.cmpi slt, %0, %33 : vector<1x256xi32>
    %c1_i32_9 = arith.constant 1 : i32
    %35 = vector.broadcast %c1_i32_9 : i32 to vector<1x256xi32>
    %36 = arith.cmpi sge, %16, %35 : vector<1x256xi32>
    %37 = arith.andi %34, %36 : vector<1x256xi1>
    %c240_i32_10 = arith.constant 240 : i32
    %38 = vector.broadcast %c240_i32_10 : i32 to vector<1x256xi32>
    %39 = arith.cmpi slt, %0, %38 : vector<1x256xi32>
    %c240_i32_11 = arith.constant 240 : i32
    %40 = vector.broadcast %c240_i32_11 : i32 to vector<1x256xi32>
    %41 = arith.cmpi slt, %0, %40 : vector<1x256xi32>
    %c15_i32_12 = arith.constant 15 : i32
    %42 = vector.broadcast %c15_i32_12 : i32 to vector<1x256xi32>
    %43 = arith.cmpi slt, %16, %42 : vector<1x256xi32>
    %44 = arith.andi %41, %43 : vector<1x256xi1>
    %cst = arith.constant 1.000000e+00 : f32
    %45 = vector.broadcast %cst : f32 to vector<1x256xf32>
    %c0 = arith.constant 0 : index
    %c0_13 = arith.constant 0 : index
    %c0_14 = arith.constant 0 : index
    %46 = vector.load %arg1[%c0, %c0_13, %c0_14] : memref<1x4x64xbf16, #tpu.memory_space<vmem>>, vector<1x4x64xbf16>
    %47 = vector.shape_cast %46 : vector<1x4x64xbf16> to vector<4x64xbf16>
    %c0_15 = arith.constant 0 : index
    %c0_16 = arith.constant 0 : index
    %48 = vector.load %arg3[%c0_15, %c0_16] : memref<64x256xbf16, #tpu.memory_space<vmem>>, vector<64x256xbf16>
    %cst_17 = arith.constant dense<0.000000e+00> : vector<4x256xf32>
    %49 = tpu.matmul %47, %48, %cst_17 {dimension_numbers = #tpu.dot_dimension_numbers<[1], [0], [0], [1], [0, 0, 1, 1], [], []>} : vector<4x64xbf16>, vector<64x256xbf16>, vector<4x256xf32> -> vector<4x256xf32>
    %c0_18 = arith.constant 0 : index
    %c0_19 = arith.constant 0 : index
    %c0_20 = arith.constant 0 : index
    %50 = vector.load %arg2[%c0_18, %c0_19, %c0_20] : memref<1x4x256xbf16, #tpu.memory_space<vmem>>, vector<1x4x256xbf16>
    %51 = vector.shape_cast %50 : vector<1x4x256xbf16> to vector<4x256xbf16>
    %52 = arith.extf %51 : vector<4x256xbf16> to vector<4x256xf32>
    %53 = tpu.concatenate %52, %49 in 0 : vector<4x256xf32>, vector<4x256xf32> -> vector<8x256xf32>
    %c17_i32 = arith.constant 17 : i32
    %54 = tpu.dynamic_rotate %53 by %c17_i32 dim 1 : vector<8x256xf32>, i32 -> vector<8x256xf32>
    %cst_21 = arith.constant 0.000000e+00 : f32
    %55 = vector.shape_cast %21 : vector<1x256xi1> to vector<1x256xi1>
    %56 = vector.broadcast %55 : vector<1x256xi1> to vector<8x256xi1>
    %57 = vector.broadcast %cst_21 : f32 to vector<8x256xf32>
    %58 = arith.select %56, %54, %57 : vector<8x256xi1>, vector<8x256xf32>
    %c16_i32_22 = arith.constant 16 : i32
    %59 = tpu.dynamic_rotate %53 by %c16_i32_22 dim 1 : vector<8x256xf32>, i32 -> vector<8x256xf32>
    %cst_23 = arith.constant 0.000000e+00 : f32
    %60 = vector.shape_cast %23 : vector<1x256xi1> to vector<1x256xi1>
    %61 = vector.broadcast %60 : vector<1x256xi1> to vector<8x256xi1>
    %62 = vector.broadcast %cst_23 : f32 to vector<8x256xf32>
    %63 = arith.select %61, %59, %62 : vector<8x256xi1>, vector<8x256xf32>
    %c15_i32_24 = arith.constant 15 : i32
    %64 = tpu.dynamic_rotate %53 by %c15_i32_24 dim 1 : vector<8x256xf32>, i32 -> vector<8x256xf32>
    %cst_25 = arith.constant 0.000000e+00 : f32
    %65 = vector.shape_cast %28 : vector<1x256xi1> to vector<1x256xi1>
    %66 = vector.broadcast %65 : vector<1x256xi1> to vector<8x256xi1>
    %67 = vector.broadcast %cst_25 : f32 to vector<8x256xf32>
    %68 = arith.select %66, %64, %67 : vector<8x256xi1>, vector<8x256xf32>
    %c1_i32_26 = arith.constant 1 : i32
    %69 = tpu.dynamic_rotate %53 by %c1_i32_26 dim 1 : vector<8x256xf32>, i32 -> vector<8x256xf32>
    %cst_27 = arith.constant 0.000000e+00 : f32
    %70 = vector.shape_cast %30 : vector<1x256xi1> to vector<1x256xi1>
    %71 = vector.broadcast %70 : vector<1x256xi1> to vector<8x256xi1>
    %72 = vector.broadcast %cst_27 : f32 to vector<8x256xf32>
    %73 = arith.select %71, %69, %72 : vector<8x256xi1>, vector<8x256xf32>
    %c255_i32 = arith.constant 255 : i32
    %74 = tpu.dynamic_rotate %53 by %c255_i32 dim 1 : vector<8x256xf32>, i32 -> vector<8x256xf32>
    %cst_28 = arith.constant 0.000000e+00 : f32
    %75 = vector.shape_cast %32 : vector<1x256xi1> to vector<1x256xi1>
    %76 = vector.broadcast %75 : vector<1x256xi1> to vector<8x256xi1>
    %77 = vector.broadcast %cst_28 : f32 to vector<8x256xf32>
    %78 = arith.select %76, %74, %77 : vector<8x256xi1>, vector<8x256xf32>
    %c241_i32 = arith.constant 241 : i32
    %79 = tpu.dynamic_rotate %53 by %c241_i32 dim 1 : vector<8x256xf32>, i32 -> vector<8x256xf32>
    %cst_29 = arith.constant 0.000000e+00 : f32
    %80 = vector.shape_cast %37 : vector<1x256xi1> to vector<1x256xi1>
    %81 = vector.broadcast %80 : vector<1x256xi1> to vector<8x256xi1>
    %82 = vector.broadcast %cst_29 : f32 to vector<8x256xf32>
    %83 = arith.select %81, %79, %82 : vector<8x256xi1>, vector<8x256xf32>
    %c240_i32_30 = arith.constant 240 : i32
    %84 = tpu.dynamic_rotate %53 by %c240_i32_30 dim 1 : vector<8x256xf32>, i32 -> vector<8x256xf32>
    %cst_31 = arith.constant 0.000000e+00 : f32
    %85 = vector.shape_cast %39 : vector<1x256xi1> to vector<1x256xi1>
    %86 = vector.broadcast %85 : vector<1x256xi1> to vector<8x256xi1>
    %87 = vector.broadcast %cst_31 : f32 to vector<8x256xf32>
    %88 = arith.select %86, %84, %87 : vector<8x256xi1>, vector<8x256xf32>
    %c239_i32 = arith.constant 239 : i32
    %89 = tpu.dynamic_rotate %53 by %c239_i32 dim 1 : vector<8x256xf32>, i32 -> vector<8x256xf32>
    %cst_32 = arith.constant 0.000000e+00 : f32
    %90 = vector.shape_cast %44 : vector<1x256xi1> to vector<1x256xi1>
    %91 = vector.broadcast %90 : vector<1x256xi1> to vector<8x256xi1>
    %92 = vector.broadcast %cst_32 : f32 to vector<8x256xf32>
    %93 = arith.select %91, %89, %92 : vector<8x256xi1>, vector<8x256xf32>
    %94 = tpu.concatenate %58, %63, %68, %73, %53, %78, %83, %88, %93, %45 in 0 : vector<8x256xf32>, vector<8x256xf32>, vector<8x256xf32>, vector<8x256xf32>, vector<8x256xf32>, vector<8x256xf32>, vector<8x256xf32>, vector<8x256xf32>, vector<8x256xf32>, vector<1x256xf32> -> vector<73x256xf32>
    %95 = arith.truncf %94 : vector<73x256xf32> to vector<73x256xbf16>
    %c0_33 = arith.constant 0 : index
    %c0_34 = arith.constant 0 : index
    %96 = vector.load %arg4[%c0_33, %c0_34] : memref<4x73xbf16, #tpu.memory_space<vmem>>, vector<4x73xbf16>
    %cst_35 = arith.constant dense<0.000000e+00> : vector<4x256xf32>
    %97 = tpu.matmul %96, %95, %cst_35 {dimension_numbers = #tpu.dot_dimension_numbers<[1], [0], [0], [1], [0, 0, 1, 1], [], []>} : vector<4x73xbf16>, vector<73x256xbf16>, vector<4x256xf32> -> vector<4x256xf32>
    %cst_36 = arith.constant 0.000000e+00 : f32
    %98 = vector.broadcast %cst_36 : f32 to vector<4x256xf32>
    %99 = arith.maximumf %97, %98 : vector<4x256xf32>
    %c17_i32_37 = arith.constant 17 : i32
    %100 = tpu.dynamic_rotate %99 by %c17_i32_37 dim 1 : vector<4x256xf32>, i32 -> vector<4x256xf32>
    %cst_38 = arith.constant 0.000000e+00 : f32
    %101 = vector.shape_cast %21 : vector<1x256xi1> to vector<1x256xi1>
    %102 = vector.broadcast %101 : vector<1x256xi1> to vector<4x256xi1>
    %103 = vector.broadcast %cst_38 : f32 to vector<4x256xf32>
    %104 = arith.select %102, %100, %103 : vector<4x256xi1>, vector<4x256xf32>
    %c16_i32_39 = arith.constant 16 : i32
    %105 = tpu.dynamic_rotate %99 by %c16_i32_39 dim 1 : vector<4x256xf32>, i32 -> vector<4x256xf32>
    %cst_40 = arith.constant 0.000000e+00 : f32
    %106 = vector.shape_cast %23 : vector<1x256xi1> to vector<1x256xi1>
    %107 = vector.broadcast %106 : vector<1x256xi1> to vector<4x256xi1>
    %108 = vector.broadcast %cst_40 : f32 to vector<4x256xf32>
    %109 = arith.select %107, %105, %108 : vector<4x256xi1>, vector<4x256xf32>
    %c15_i32_41 = arith.constant 15 : i32
    %110 = tpu.dynamic_rotate %99 by %c15_i32_41 dim 1 : vector<4x256xf32>, i32 -> vector<4x256xf32>
    %cst_42 = arith.constant 0.000000e+00 : f32
    %111 = vector.shape_cast %28 : vector<1x256xi1> to vector<1x256xi1>
    %112 = vector.broadcast %111 : vector<1x256xi1> to vector<4x256xi1>
    %113 = vector.broadcast %cst_42 : f32 to vector<4x256xf32>
    %114 = arith.select %112, %110, %113 : vector<4x256xi1>, vector<4x256xf32>
    %c1_i32_43 = arith.constant 1 : i32
    %115 = tpu.dynamic_rotate %99 by %c1_i32_43 dim 1 : vector<4x256xf32>, i32 -> vector<4x256xf32>
    %cst_44 = arith.constant 0.000000e+00 : f32
    %116 = vector.shape_cast %30 : vector<1x256xi1> to vector<1x256xi1>
    %117 = vector.broadcast %116 : vector<1x256xi1> to vector<4x256xi1>
    %118 = vector.broadcast %cst_44 : f32 to vector<4x256xf32>
    %119 = arith.select %117, %115, %118 : vector<4x256xi1>, vector<4x256xf32>
    %c255_i32_45 = arith.constant 255 : i32
    %120 = tpu.dynamic_rotate %99 by %c255_i32_45 dim 1 : vector<4x256xf32>, i32 -> vector<4x256xf32>
    %cst_46 = arith.constant 0.000000e+00 : f32
    %121 = vector.shape_cast %32 : vector<1x256xi1> to vector<1x256xi1>
    %122 = vector.broadcast %121 : vector<1x256xi1> to vector<4x256xi1>
    %123 = vector.broadcast %cst_46 : f32 to vector<4x256xf32>
    %124 = arith.select %122, %120, %123 : vector<4x256xi1>, vector<4x256xf32>
    %c241_i32_47 = arith.constant 241 : i32
    %125 = tpu.dynamic_rotate %99 by %c241_i32_47 dim 1 : vector<4x256xf32>, i32 -> vector<4x256xf32>
    %cst_48 = arith.constant 0.000000e+00 : f32
    %126 = vector.shape_cast %37 : vector<1x256xi1> to vector<1x256xi1>
    %127 = vector.broadcast %126 : vector<1x256xi1> to vector<4x256xi1>
    %128 = vector.broadcast %cst_48 : f32 to vector<4x256xf32>
    %129 = arith.select %127, %125, %128 : vector<4x256xi1>, vector<4x256xf32>
    %c240_i32_49 = arith.constant 240 : i32
    %130 = tpu.dynamic_rotate %99 by %c240_i32_49 dim 1 : vector<4x256xf32>, i32 -> vector<4x256xf32>
    %cst_50 = arith.constant 0.000000e+00 : f32
    %131 = vector.shape_cast %39 : vector<1x256xi1> to vector<1x256xi1>
    %132 = vector.broadcast %131 : vector<1x256xi1> to vector<4x256xi1>
    %133 = vector.broadcast %cst_50 : f32 to vector<4x256xf32>
    %134 = arith.select %132, %130, %133 : vector<4x256xi1>, vector<4x256xf32>
    %c239_i32_51 = arith.constant 239 : i32
    %135 = tpu.dynamic_rotate %99 by %c239_i32_51 dim 1 : vector<4x256xf32>, i32 -> vector<4x256xf32>
    %cst_52 = arith.constant 0.000000e+00 : f32
    %136 = vector.shape_cast %44 : vector<1x256xi1> to vector<1x256xi1>
    %137 = vector.broadcast %136 : vector<1x256xi1> to vector<4x256xi1>
    %138 = vector.broadcast %cst_52 : f32 to vector<4x256xf32>
    %139 = arith.select %137, %135, %138 : vector<4x256xi1>, vector<4x256xf32>
    %140 = tpu.concatenate %104, %109, %114, %119, %99, %124, %129, %134, %139, %45 in 0 : vector<4x256xf32>, vector<4x256xf32>, vector<4x256xf32>, vector<4x256xf32>, vector<4x256xf32>, vector<4x256xf32>, vector<4x256xf32>, vector<4x256xf32>, vector<4x256xf32>, vector<1x256xf32> -> vector<37x256xf32>
    %141 = arith.truncf %140 : vector<37x256xf32> to vector<37x256xbf16>
    %c0_53 = arith.constant 0 : index
    %c0_54 = arith.constant 0 : index
    %142 = vector.load %arg5[%c0_53, %c0_54] : memref<8x37xbf16, #tpu.memory_space<vmem>>, vector<8x37xbf16>
    %cst_55 = arith.constant dense<0.000000e+00> : vector<8x256xf32>
    %143 = tpu.matmul %142, %141, %cst_55 {dimension_numbers = #tpu.dot_dimension_numbers<[1], [0], [0], [1], [0, 0, 1, 1], [], []>} : vector<8x37xbf16>, vector<37x256xbf16>, vector<8x256xf32> -> vector<8x256xf32>
    %cst_56 = arith.constant 0.000000e+00 : f32
    %144 = vector.broadcast %cst_56 : f32 to vector<8x256xf32>
    %145 = arith.maximumf %143, %144 : vector<8x256xf32>
    %c0_57 = arith.constant 0 : index
    %c0_58 = arith.constant 0 : index
    %c0_59 = arith.constant 0 : index
    %146 = vector.load %arg6[%c0_57, %c0_58, %c0_59] : memref<1x8x256xf32, #tpu.memory_space<vmem>>, vector<1x8x256xf32>
    %147 = vector.shape_cast %146 : vector<1x8x256xf32> to vector<8x256xf32>
    %148 = vector.shape_cast %145 : vector<8x256xf32> to vector<1x8x256xf32>
    tpu.vector_store %arg6[%c0_57, %c0_58, %c0_59], %148 {strides = array<i32>} : memref<1x8x256xf32, #tpu.memory_space<vmem>>, vector<1x8x256xf32>,
    return
  }
  func.func @transform_0(%arg0: i32) -> (i32, i32, i32) {
    %c0_i32 = arith.constant 0 : i32
    %c0_i32_0 = arith.constant 0 : i32
    %c0_i32_1 = arith.constant 0 : i32
    return %arg0, %c0_i32, %c0_i32_0 : i32, i32, i32
  }
  func.func @transform_1(%arg0: i32) -> (i32, i32, i32) {
    %c0_i32 = arith.constant 0 : i32
    %c0_i32_0 = arith.constant 0 : i32
    %c0_i32_1 = arith.constant 0 : i32
    return %arg0, %c0_i32, %c0_i32_0 : i32, i32, i32
  }
  func.func @transform_2(%arg0: i32) -> (i32, i32) {
    %c0_i32 = arith.constant 0 : i32
    %c0_i32_0 = arith.constant 0 : i32
    %c0_i32_1 = arith.constant 0 : i32
    return %c0_i32, %c0_i32_0 : i32, i32
  }
  func.func @transform_3(%arg0: i32) -> (i32, i32) {
    %c0_i32 = arith.constant 0 : i32
    %c0_i32_0 = arith.constant 0 : i32
    %c0_i32_1 = arith.constant 0 : i32
    return %c0_i32, %c0_i32_0 : i32, i32
  }
  func.func @transform_4(%arg0: i32) -> (i32, i32) {
    %c0_i32 = arith.constant 0 : i32
    %c0_i32_0 = arith.constant 0 : i32
    %c0_i32_1 = arith.constant 0 : i32
    return %c0_i32, %c0_i32_0 : i32, i32
  }
  func.func @transform_5(%arg0: i32) -> (i32, i32, i32) {
    %c0_i32 = arith.constant 0 : i32
    %c0_i32_0 = arith.constant 0 : i32
    %c0_i32_1 = arith.constant 0 : i32
    return %arg0, %c0_i32, %c0_i32_0 : i32, i32, i32
  }
}

</mosaic_0001>

<bundles_post_ra>
// kernel: up_forward.1
= control target key start
LH: loop header
LB: loop body
LE: loop exit
PB: predicated region body
PF: predicated region fallthrough
CT: control target
= control target key end

     0   :  { %s1007_s18 = smov 0   ;;  %s1301_s0 = inlined_call_operand.vmem [shape: bf16[2,4,64], index: 0, kind: input, shape index: {}]   ;;  %s1302_s1 = inlined_call_operand.vmem [shape: bf16[2,4,256], index: 1, kind: input, shape index: {}]   ;;  %s1303_s2 = inlined_call_operand.vmem [shape: bf16[64,256], index: 2, kind: input, shape index: {}]   ;;  %s1304_s3 = inlined_call_operand.vmem [shape: bf16[4,73], index: 3, kind: input, shape index: {}]   ;;  %s1305_s4 = inlined_call_operand.vmem [shape: bf16[8,37], index: 4, kind: input, shape index: {}]   ;;  %s1306_s5 = inlined_call_operand.vmem [shape: f32[2,8,256], index: 5, kind: output, shape index: {}]  }
   0x1 LB: > { %s796_s19 = sadd.s32 4294967295, %s963_s18   ;;  %p800_p0 = scmp.ge.s32.totalorder %s963_s18, 1  ;;  %s963_s18 = sphi %s1007_s18, %s15_s18  }
   0x2   : > { %p196_p1 = scmp.lt.s32.totalorder %s963_s18, 3 }
   0x4   : > { %p197_p2 = pnand %p800_p0, %p196_p1 }
   0x5   : > { %p228_p3 = scmp.lt.s32.totalorder (!%p197_p2), %s796_s19, 1  ;;  %s966_s21 = smov (!%p197_p2), 112  }
   0x6   : > { %200 = sbr.rel (%p197_p2) target bundleno = 914 (0x392), region = 40  ;;  %s967_s22 = smov (!%p197_p2), 111  }
   0x7   : > { %s968_s23 = smov (!%p197_p2), 127   ;;  %s969_s24 = smov (!%p197_p2), 113  }
   0x8   : > { %s970_s25 = smov (!%p197_p2), 1   ;;  %s971_s26 = smov (!%p197_p2), 15  }
   0x9   : > { %s972_s27 = smov (!%p197_p2), 16   ;;  %s973_s28 = smov (!%p197_p2), 17  }
   0xb   : > { %v945_v0 = vld [vmem:[%s1303_s2 + $0x34] ss:$8 sps:$4 sm:$0xff]   ;;  %v947_v1 = vld [vmem:[%s1303_s2 + $0x30] ss:$8 sps:$4 sm:$0xff]   ;;  %v965_v2 = vmov 0   ;;  %s1358_s19 = smov (!%p228_p3, %s796_s19), 1  ;;  %v243_v22 = vlaneseq }
   0xc   : > { %371 = vmatprep.mubr.bf16.mxu0 %v965_v2  ;;  %554 = vmatprep.mubr.bf16.mxu1 %v965_v2  ;;  %v948_v3 = vld [vmem:[%s1303_s2 + $0x24] ss:$8 sps:$4 sm:$0xff]   ;;  %v950_v4 = vld [vmem:[%s1303_s2 + $0x20] ss:$8 sps:$4 sm:$0xff]   ;;  %v951_v5 = vld [vmem:[%s1303_s2 + $0x14] ss:$8 sps:$4 sm:$0xff]  }
   0xd   : > { %347 = vmatprep.subr.bf16.mxu0 %v945_v0  ;;  %v953_v6 = vld [vmem:[%s1303_s2 + $0x10] ss:$8 sps:$4 sm:$0xff]   ;;  %v954_v7 = vld [vmem:[%s1303_s2 + $0x4] ss:$8 sps:$4 sm:$0xff]   ;;  %s801_s9 = sshll.u32 %s1358_s19, 1  ;;  %vm335_vm0 = vcmask 523264  }
   0xe   : > { %348 = vmatpush1.bf16.msra.mxu0 %v947_v1  ;;  %v956_v8 = vld [vmem:[%s1303_s2] ss:$8 sps:$4 sm:$0xff]   ;;  %s231_s14 = scalar_lea.vmem %s1301_s0, %s801_s9  ;;  %s843_s15 = sshll.u32 %s1358_s19, 2  ;;  %vm1309_vm1 = vcmask 1043456   ;;  %v1065_v23 = vand.u32 127, %v243_v22  ;;  %vm513_vm7 = vcmask 1044480  }
   0xf   : > { %349 = vmatprep.subr.bf16.mxu0 %v948_v3  ;;  %v286_v9 = vld [vmem:[%s231_s14] sm:$0x3]  ;;  %s236_s20 = scalar_lea.vmem %s1302_s1, %s843_s15  ;;  %v974_v35 = vmov 65535   ;;  %v975_v47 = vmov 1.0   ;;  %s844_s8 = sshll.u32 %s1358_s19, 4 }
  0x10   : > { %v380_v10 = vld [vmem:[%s236_s20] sm:$0xf]  ;;  %v1068_v24 = vadd.s32 128, %v1065_v23  ;;  %v250_v26 = vand.u32 15, %v1065_v23  ;;  %vm1311_vm4 = vcmp.lt.s32.totalorder %v1065_v23, 111  ;;  %v514_v36 = vsel %vm1309_vm1, 4294967295, %v974_v35  ;;  %s241_s11 = scalar_lea.vmem %s1306_s5, %s844_s8 }
  0x11   : > { %v381_v11 = vunpack.c.l.bf16 %v380_v10  ;;  %vm1308_vm8 = vcmp.lt.s32.totalorder %v1065_v23, 113  ;;  %vm1310_vm10 = vcmp.lt.s32.totalorder %v1065_v23, 112  ;;  %v515_v51 = vsel %vm513_vm7, %v514_v36, 0 }
  0x12   : > { %350 = vmatpush1.bf16.msra.mxu0 %v950_v4  ;;  %v257_v25 = vand.u32 15, %v1068_v24  ;;  %vm1307_vm3 = vcmp.lt.s32.totalorder %v1068_v24, 240  ;;  %vm1086_vm6 = vcmp.lt.s32.totalorder %v250_v26, 15  ;;  %vm1312_vm12 = vcmp.lt.s32.totalorder %v1065_v23, 127 }
  0x13   : > { %351 = vmatprep.subr.bf16.mxu0 %v951_v5  ;;  %v383_v14 = vcombine.high %v381_v11, %v381_v11  ;;  %vm1126_vm14 = vcmp.ge.s32.totalorder %v250_v26, 1  ;;  %vm1313_vm15 = vcmp.lt.s32.totalorder %v1065_v23, 1  ;;  %vm976_vm7 = vmmov 1   ;;  %v669_v26 = vld [vmem:[%s1305_s4] sm:$0xf] }
  0x14   : > { %vm1072_vm2 = vcmp.lt.s32.totalorder %v257_v25, 15  ;;  %vm1101_vm9 = vcmp.ge.s32.totalorder %v257_v25, 1 }
  0x15   : > { %vm1082_vm5 = vmand %vm1307_vm3, %vm1072_vm2 }
  0x16   : > { %352 = vmatpush1.bf16.msra.mxu0 %v953_v6  ;;  %vm1113_vm11 = vmand %vm1307_vm3, %vm1101_vm9 }
  0x17   : > { %353 = vmatprep.subr.bf16.mxu0 %v954_v7  ;;  %vm815_vm13 = vmpackc.low %vm1307_vm3, %vm1113_vm11 }
  0x18   : > { %vm818_vm3 = vmpackc.low %vm976_vm7, %vm1126_vm14 }
  0x1a   : > { %354 = vmatpush1.bf16.msra.mxu0 %v956_v8 }
  0x1d   : > { %814 = vmatmul.mubr.msk.bf16.vlgmr.msra.gmra.mxu0 %vm335_vm0, %v286_v9  ;;  %vm1314_vm0 = vcmp.lt.s32.totalorder %v1065_v23, 15 }
  0x1e   : > { %716 = vmatprep.mubr.bf16.mxu0 %v965_v2 }
  0xdd   : > { %v373_v12 = vpop.f32.mrf.mxu0 }
  0xde   : > { %v387_v13 = vrot.slane %v373_v12, 4 }
  0xdf   : > { %v375_v15 = vpop.f32.mrf.mxu0 }
  0xe0   : > { %v388_v16 = vrot.slane %v375_v15, 4  ;;  %v1050_v18 = vsel %vm1309_vm1, %v381_v11, %v387_v13 }
  0xe1   : > { %v377_v17 = vpop.f32.mrf.mxu0 }
  0xe2   : > { %v1053_v19 = vsel %vm1309_vm1, %v383_v14, %v388_v16  ;;  %vm270_vm1 = vcmp.ge.s32.totalorder %v1065_v23, 16 }
  0xe3   : > { %v378_v20 = vpop.f32.mrf.mxu0  ;;  %v875_v21 = vpack.i.bf16 %v1053_v19, %v1050_v18 }
  0xe5   : > { %876 = vrot.lane.b32.xlu1 %v875_v21, %s966_s21  ;;  %866 = vrot.lane.b32.xlu0 %v875_v21, %s967_s22 }
  0xe9   : > { %881 = vrot.lane.b32.xlu1 %v875_v21, %s968_s23  ;;  %871 = vrot.lane.b32.xlu0 %v875_v21, %s969_s24 }
  0xed   : > { %891 = vrot.lane.b32.xlu1 %v875_v21, %s970_s25  ;;  %886 = vrot.lane.b32.xlu0 %v875_v21, %s971_s26 }
  0xf1   : > { %901 = vrot.lane.b32.xlu1 %v875_v21, %s972_s27  ;;  %896 = vrot.lane.b32.xlu0 %v875_v21, %s973_s28 }
 0x157   : > { %v877_v28 = vpop.permute.xlu1 %876  ;;  %v867_v29 = vpop.permute.xlu0 %866 }
 0x158   : > { %v869_v30 = vunpack.i.h.bf16 %v867_v29  ;;  %v868_v31 = vunpack.i.l.bf16 %v867_v29  ;;  %v879_v43 = vunpack.i.h.bf16 %v877_v28  ;;  %v878_v44 = vunpack.i.l.bf16 %v877_v28 }
 0x15a   : > { %v491_v34 = vsel %vm1311_vm4, %v869_v30, %v868_v31  ;;  %v490_v37 = vsel %vm1311_vm4, %v868_v31, %v869_v30  ;;  %v478_v55 = vsel %vm1310_vm10, %v879_v43, %v878_v44  ;;  %v477_v4 = vsel %vm1310_vm10, %v878_v44, %v879_v43 }
 0x15b   : > { %v882_v38 = vpop.permute.xlu1 %881  ;;  %v872_v39 = vpop.permute.xlu0 %871  ;;  %v497_v40 = vsel %vm1082_vm5, %v491_v34, 0.0  ;;  %v496_v41 = vsel %vm1086_vm6, %v490_v37, 0.0  ;;  %vm411_vm10 = vcmp.lt.s32.totalorder %v1065_v23, 16  ;;  %vm1315_vm4 = vcmp.lt.s32.totalorder %v1065_v23, 17  ;;  %v508_v34 = vld [vmem:[%s1304_s3] sm:$0x3] }
 0x15c   : > { %v874_v45 = vunpack.i.h.bf16 %v872_v39  ;;  %v873_v46 = vunpack.i.l.bf16 %v872_v39  ;;  %v507_v48 = vpack.c.bf16 %v975_v47, %v497_v40  ;;  %v506_v49 = vpack.c.bf16 %v975_v47, %v496_v41 }
 0x15d   : > { %v884_v56 = vunpack.i.h.bf16 %v882_v38  ;;  %v883_v57 = vunpack.i.l.bf16 %v882_v38 }
 0x15e   : > { %v465_v50 = vsel %vm1308_vm8, %v874_v45, %v873_v46  ;;  %v520_v59 = vand.u32 %v515_v51, %v507_v48  ;;  %v517_v60 = vand.u32 %v515_v51, %v506_v49  ;;  %v464_v61 = vsel %vm1308_vm8, %v873_v46, %v874_v45  ;;  %vm821_vm8 = vmpackc.low %vm1072_vm2, %vm976_vm7 }
 0x15f   : > { %v892_v52 = vpop.permute.xlu1 %891  ;;  %v887_v53 = vpop.permute.xlu0 %886  ;;  %v816_v58 = vpack.c.bf16 %v478_v55, %v465_v50  ;;  %v452_v3 = vsel %vm1312_vm12, %v884_v56, %v883_v57  ;;  %v819_v7 = vpack.c.bf16 %v477_v4, %v464_v61  ;;  %v451_v8 = vsel %vm1312_vm12, %v883_v57, %v884_v56  ;;  %vm1159_vm12 = vmand %vm270_vm1, %vm1086_vm6 }
 0x160   : > { %v894_v63 = vunpack.i.h.bf16 %v892_v52  ;;  %v893_v0 = vunpack.i.l.bf16 %v892_v52  ;;  %v889_v1 = vunpack.i.h.bf16 %v887_v53  ;;  %v888_v2 = vunpack.i.l.bf16 %v887_v53  ;;  %528 = vmatprep.subr.bf16.mxu1 %v520_v59 }
 0x161   : > { %529 = vmatpush1.bf16.msra.mxu1 %v517_v60  ;;  %v822_v9 = vpack.c.bf16 %v452_v3, %v1053_v19  ;;  %v825_v17 = vpack.c.bf16 %v451_v8, %v1050_v18 }
 0x162   : > { %817 = vmatprep.subr.msk.bf16.mxu1 %vm815_vm13, %v816_v58  ;;  %v438_v10 = vsel %vm1313_vm15, %v893_v0, %v894_v63  ;;  %v425_v11 = vsel %vm1314_vm0, %v888_v2, %v889_v1  ;;  %vm824_vm13 = vmpackc.low %vm1086_vm6, %vm976_vm7  ;;  %v439_v19 = vsel %vm1313_vm15, %v894_v63, %v893_v0  ;;  %v426_v20 = vsel %vm1314_vm0, %v889_v1, %v888_v2 }
 0x163   : > { %v902_v5 = vpop.permute.xlu1 %901  ;;  %v897_v6 = vpop.permute.xlu0 %896  ;;  %v828_v21 = vpack.c.bf16 %v438_v10, %v425_v11  ;;  %vm833_vm15 = vmpackc.low %vm976_vm7, %vm1101_vm9  ;;  %v831_v18 = vpack.c.bf16 %v439_v19, %v426_v20 }
 0x164   : > { %v904_v12 = vunpack.i.h.bf16 %v902_v5  ;;  %v903_v13 = vunpack.i.l.bf16 %v902_v5  ;;  %v899_v14 = vunpack.i.h.bf16 %v897_v6  ;;  %v898_v15 = vunpack.i.l.bf16 %v897_v6  ;;  %vm1187_vm0 = vmand %vm270_vm1, %vm1126_vm14 }
 0x165   : > { %820 = vmatpush1.bf16.msk.msra.mxu1 %vm818_vm3, %v819_v7  ;;  %vm827_vm3 = vmpackc.low %vm1101_vm9, %vm1072_vm2 }
 0x166   : > { %823 = vmatprep.subr.msk.bf16.mxu1 %vm821_vm8, %v822_v9  ;;  %v412_v22 = vsel %vm411_vm10, %v903_v13, %v904_v12  ;;  %v399_v25 = vsel %vm1315_vm4, %v898_v15, %v899_v14  ;;  %vm830_vm8 = vmpackc.low %vm1126_vm14, %vm1159_vm12  ;;  %v413_v28 = vsel %vm411_vm10, %v904_v12, %v903_v13  ;;  %v400_v29 = vsel %vm1315_vm4, %v899_v14, %v898_v15 }
 0x167   : > { %v834_v30 = vpack.c.bf16 %v412_v22, %v399_v25  ;;  %vm836_vm7 = vmpackc.low %vm270_vm1, %vm1187_vm0  ;;  %v837_v31 = vpack.c.bf16 %v413_v28, %v400_v29 }
 0x169   : > { %826 = vmatpush1.bf16.msk.msra.mxu1 %vm824_vm13, %v825_v17  ;;  %vm509_vm13 = vcmask 596992  }
 0x16a   : > { %829 = vmatprep.subr.msk.bf16.mxu1 %vm827_vm3, %v828_v21  ;;  %vm675_vm3 = vcmask 1042432  }
 0x16d   : > { %832 = vmatpush1.bf16.msk.msra.mxu1 %vm830_vm8, %v831_v18  ;;  %vm1332_vm8 = vcmp.lt.s32.totalorder %v1065_v23, 127 }
 0x16e   : > { %835 = vmatprep.subr.msk.bf16.mxu1 %vm833_vm15, %v834_v30  ;;  %vm674_vm15 = vcmask 1041408  }
 0x16f   : > { %v676_v44 = vsel %vm674_vm15, 4294967295, %v974_v35 }
 0x170   : > { %v677_v51 = vsel %vm675_vm3, %v676_v44, 0  ;;  %vm1338_vm3 = vcmp.lt.s32.totalorder %v1065_v23, 113 }
 0x171   : > { %838 = vmatpush1.bf16.msk.msra.mxu1 %vm836_vm7, %v837_v31  ;;  %vm1333_vm7 = vmmov %vm1332_vm8 }
 0x174   : > { %839 = vmatmul.mubr.msk.bf16.vlgmr.msra.gmra.mxu1 %vm509_vm13, %v508_v34  ;;  %vm1334_vm13 = vcmp.lt.s32.totalorder %v1065_v23, 111 }
 0x175   : > { %vm1335_vm4 = vmmov %vm1334_vm13 }
 0x234   : > { %v1202_v36 = vpop.f32.mrf.mxu1 }
 0x235   : > { %v563_v38 = vmax.f32 %v1202_v36, 0.0 }
 0x236   : > { %v1204_v37 = vpop.f32.mrf.mxu1 }
 0x237   : > { %v564_v39 = vmax.f32 %v1204_v37, 0.0 }
 0x238   : > { %v560_v40 = vpop.f32.mrf.mxu1 }
 0x239   : > { %v910_v41 = vpack.i.bf16 %v564_v39, %v563_v38 }
 0x23a   : > { %v561_v43 = vpop.f32.mrf.mxu1 }
 0x23b   : > { %911 = vrot.lane.b32.xlu1 %v910_v41, %s968_s23  ;;  %906 = vrot.lane.b32.xlu0 %v910_v41, %s967_s22 }
 0x23f   : > { %921 = vrot.lane.b32.xlu1 %v910_v41, %s969_s24  ;;  %916 = vrot.lane.b32.xlu0 %v910_v41, %s966_s21 }
 0x243   : > { %931 = vrot.lane.b32.xlu1 %v910_v41, %s972_s27  ;;  %926 = vrot.lane.b32.xlu0 %v910_v41, %s970_s25 }
 0x247   : > { %941 = vrot.lane.b32.xlu1 %v910_v41, %s971_s26  ;;  %936 = vrot.lane.b32.xlu0 %v910_v41, %s973_s28 }
 0x2ad   : > { %v912_v45 = vpop.permute.xlu1 %911  ;;  %v907_v46 = vpop.permute.xlu0 %906 }
 0x2ae   : > { %v914_v47 = vunpack.i.h.bf16 %v912_v45  ;;  %v913_v48 = vunpack.i.l.bf16 %v912_v45  ;;  %v909_v49 = vunpack.i.h.bf16 %v907_v46  ;;  %v908_v50 = vunpack.i.l.bf16 %v907_v46 }
 0x2b0   : > { %v601_v52 = vsel %vm1332_vm8, %v913_v48, %v914_v47  ;;  %v602_v53 = vsel %vm1333_vm7, %v914_v47, %v913_v48  ;;  %v625_v55 = vsel %vm1334_vm13, %v908_v50, %v909_v49  ;;  %v626_v35 = vsel %vm1335_vm4, %v909_v49, %v908_v50 }
 0x2b1   : > { %v603_v56 = vsel %vm1086_vm6, %v601_v52, 0.0  ;;  %v604_v57 = vsel %vm1072_vm2, %v602_v53, 0.0  ;;  %v627_v58 = vsel %vm1086_vm6, %v625_v55, 0.0  ;;  %v922_v59 = vpop.permute.xlu1 %921  ;;  %v917_v60 = vpop.permute.xlu0 %916  ;;  %v628_v61 = vsel %vm1082_vm5, %v626_v35, 0.0  ;;  %vm1339_vm6 = vmmov %vm1338_vm3 }
 0x2b2   : > { %v643_v63 = vrot.slane %v603_v56, 4  ;;  %v644_v0 = vrot.slane %v604_v57, 4  ;;  %v924_v1 = vunpack.i.h.bf16 %v922_v59  ;;  %v923_v2 = vunpack.i.l.bf16 %v922_v59 }
 0x2b3   : > { %v919_v3 = vunpack.i.h.bf16 %v917_v60  ;;  %v918_v4 = vunpack.i.l.bf16 %v917_v60  ;;  %vm1336_vm4 = vcmask 1043456   ;;  %vm1340_vm5 = vcmp.lt.s32.totalorder %v1065_v23, 112 }
 0x2b4   : > { %v661_v5 = vsel %vm1336_vm4, %v627_v58, 1.0  ;;  %vm1337_vm15 = vmmov %vm1336_vm4  ;;  %v609_v7 = vsel %vm1338_vm3, %v923_v2, %v924_v1  ;;  %v610_v33 = vsel %vm1339_vm6, %v924_v1, %v923_v2  ;;  %vm1342_vm7 = vcmp.lt.s32.totalorder %v1068_v24, 240 }
 0x2b5   : > { %v662_v6 = vsel %vm1337_vm15, %v628_v61, 1.0  ;;  %v667_v8 = vpack.c.bf16 %v661_v5, %v661_v5  ;;  %v611_v32 = vsel %vm1126_vm14, %v609_v7, 0.0  ;;  %v617_v10 = vsel %vm1340_vm5, %v918_v4, %v919_v3  ;;  %vm1341_vm8 = vmmov %vm1340_vm5  ;;  %v932_v12 = vpop.permute.xlu1 %931  ;;  %v927_v13 = vpop.permute.xlu0 %926 }
 0x2b6   : > { %v668_v9 = vpack.c.bf16 %v662_v6, %v662_v6  ;;  %v618_v11 = vsel %vm1341_vm8, %v919_v3, %v918_v4  ;;  %v612_v14 = vsel %vm1113_vm11, %v610_v33, 0.0  ;;  %v649_v17 = vrot.slane %v617_v10, 4  ;;  %vm1343_vm13 = vmmov %vm1336_vm4 }
 0x2b7   : > { %v620_v15 = vsel %vm1342_vm7, %v618_v11, 0.0  ;;  %v934_v19 = vunpack.i.h.bf16 %v932_v12  ;;  %v933_v20 = vunpack.i.l.bf16 %v932_v12  ;;  %v929_v22 = vunpack.i.h.bf16 %v927_v13 }
 0x2b8   : > { %v650_v21 = vrot.slane %v620_v15, 4  ;;  %v928_v25 = vunpack.i.l.bf16 %v927_v13  ;;  %v679_v18 = vand.u32 %v677_v51, %v667_v8  ;;  %v682_v30 = vand.u32 %v677_v51, %v668_v9 }
 0x2b9   : > { %v577_v28 = vsel %vm411_vm10, %v933_v20, %v934_v19  ;;  %v578_v29 = vsel %vm411_vm10, %v934_v19, %v933_v20  ;;  %v658_v54 = vsel %vm1343_vm13, %v564_v39, %v644_v0  ;;  %vm1344_vm11 = vcmp.lt.s32.totalorder %v1065_v23, 1  ;;  %v942_v40 = vpop.permute.xlu1 %941  ;;  %v937_v41 = vpop.permute.xlu0 %936 }
 0x2ba   : > { %v579_v24 = vsel %vm270_vm1, %v578_v29, 0.0  ;;  %v632_v31 = vrot.slane %v577_v28, 4  ;;  %v593_v34 = vsel %vm1344_vm11, %v928_v25, %v929_v22  ;;  %vm1345_vm4 = vmmov %vm1344_vm11  ;;  %694 = vmatprep.subr.bf16.mxu0 %v682_v30  ;;  %v944_v39 = vunpack.i.h.bf16 %v942_v40 }
 0x2bb   : > { %v594_v37 = vsel %vm1345_vm4, %v929_v22, %v928_v25  ;;  %v631_v43 = vrot.slane %v579_v24, 4  ;;  %v596_v45 = vsel %vm1101_vm9, %v593_v34, 0.0  ;;  %695 = vmatpush1.bf16.msra.mxu0 %v679_v18  ;;  %v943_v48 = vunpack.i.l.bf16 %v942_v40  ;;  %vm1346_vm1 = vmmov %vm1343_vm13 }
 0x2bc   : > { %v595_v44 = vsel %vm1126_vm14, %v594_v37, 0.0  ;;  %v638_v47 = vrot.slane %v596_v45, 4  ;;  %v939_v49 = vunpack.i.h.bf16 %v937_v41  ;;  %v938_v50 = vunpack.i.l.bf16 %v937_v41  ;;  %vm1347_vm10 = vmmov %vm1346_vm1 }
 0x2bd   : > { %v637_v46 = vrot.slane %v595_v44, 4  ;;  %v660_v51 = vsel %vm1346_vm1, %v612_v14, %v650_v21  ;;  %v657_v52 = vsel %vm1347_vm10, %v563_v38, %v643_v63  ;;  %vm1348_vm15 = vmmov %vm1346_vm1  ;;  %vm1349_vm14 = vcmp.lt.s32.totalorder %v1065_v23, 15 }
 0x2be   : > { %v659_v62 = vsel %vm1348_vm15, %v611_v32, %v649_v17  ;;  %v585_v53 = vsel %vm1349_vm14, %v943_v48, %v944_v39  ;;  %vm1350_vm3 = vmmov %vm1349_vm14  ;;  %v666_v35 = vpack.c.bf16 %v660_v51, %v658_v54  ;;  %vm1351_vm6 = vcmp.lt.s32.totalorder %v1065_v23, 17 }
 0x2bf   : > { %v586_v55 = vsel %vm1350_vm3, %v944_v39, %v943_v48  ;;  %v665_v56 = vpack.c.bf16 %v659_v62, %v657_v52  ;;  %v588_v58 = vsel %vm1072_vm2, %v585_v53, 0.0  ;;  %v569_v36 = vsel %vm1351_vm6, %v938_v50, %v939_v49  ;;  %vm1352_vm5 = vmmov %vm1351_vm6 }
 0x2c0   : > { %v587_v57 = vsel %vm1159_vm12, %v586_v55, 0.0  ;;  %v570_v38 = vsel %vm1352_vm5, %v939_v49, %v938_v50  ;;  %vm1353_vm8 = vmmov %vm1346_vm1  ;;  %v572_v61 = vsel %vm1101_vm9, %v569_v36, 0.0  ;;  %696 = vmatprep.subr.bf16.mxu0 %v666_v35 }
 0x2c1   : > { %v655_v59 = vsel %vm1353_vm8, %v587_v57, %v637_v46  ;;  %v571_v60 = vsel %vm1187_vm0, %v570_v38, 0.0  ;;  %vm1354_vm12 = vmmov %vm1346_vm1  ;;  %697 = vmatpush1.bf16.msra.mxu0 %v665_v56  ;;  %vm670_vm0 = vcmask 302080  }
 0x2c2   : > { %v656_v16 = vsel %vm1354_vm12, %v588_v58, %v638_v47  ;;  %vm1355_vm7 = vmmov %vm1346_vm1 }
 0x2c3   : > { %v653_v27 = vsel %vm1355_vm7, %v571_v60, %v631_v43  ;;  %vm1356_vm2 = vmmov %vm1346_vm1 }
 0x2c4   : > { %v654_v63 = vsel %vm1356_vm2, %v572_v61, %v632_v31  ;;  %v663_v23 = vpack.c.bf16 %v655_v59, %v653_v27 }
 0x2c5   : > { %v664_v0 = vpack.c.bf16 %v656_v16, %v654_v63 }
 0x2c7   : > { %698 = vmatprep.subr.bf16.mxu0 %v664_v0 }
 0x2c8   : > { %699 = vmatpush1.bf16.msra.mxu0 %v663_v23 }
 0x2cb   : > { %840 = vmatmul.mubr.msk.bf16.vlgmr.msra.gmra.mxu0 %vm670_vm0, %v669_v26 }
 0x38b   : > { %v718_v42 = vpop.f32.mrf.mxu0 }
 0x38c   : > { %v725_v1 = vmax.f32 %v718_v42, 0.0 }
 0x38d   : > { %v720_v2 = vpop.f32.mrf.mxu0 }
 0x38e   : > { %727 = vst [vmem:[%s241_s11] sm:$0xff] %v725_v1  ;;  %v726_v3 = vmax.f32 %v720_v2, 0.0 }
 0x38f   : > { %v722_v4 = vpop.f32.mrf.mxu0 }
 0x390   : > { %728 = vst [vmem:[%s241_s11 + $0x8] sm:$0xff] %v726_v3 }
 0x391   : > { %v723_v5 = vpop.f32.mrf.mxu0 }
 0x392 PF: > { %s15_s18 = sadd.s32 1, %s963_s18  }
 0x393   : > { %p12_p4 = scmp.ge.s32.totalorder %s15_s18, 4  }
 0x395   :  { %14 = sbr.rel (!%p12_p4) target bundleno = 1 (0x1), region = 73 }

</bundles_post_ra>
